<compile_context>
chip_gen: v7x
topology: tpu7x:2x2x1
jax: 0.10.0
libtpu: 0.0.40
codegen_flags: <defaults>
</compile_context>

<pallas_src>
import functools

import jax
import jax.numpy as jnp
from jax.experimental import pallas as pl
from jax.experimental.pallas import tpu as pltpu

EPS = 1e-5  # PyTorch nn.LayerNorm default eps


def _layernorm(x, g, b):
    mean = jnp.mean(x, axis=-1, keepdims=True)
    var = jnp.mean((x - mean) ** 2, axis=-1, keepdims=True)
    return (x - mean) * jax.lax.rsqrt(var + EPS) * g + b


def _gelu(x):
    # exact (erf) GELU — matches torch.nn.GELU() default
    return 0.5 * x * (1.0 + jax.lax.erf(x * 0.7071067811865476))


def vit_decoder_kernel(x_ref,
                       n1g_ref, n1b_ref, wqkv_ref, bqkv_ref, projw_ref, projb_ref,
                       n2g_ref, n2b_ref, fc1w_ref, fc1b_ref, fc2w_ref, fc2b_ref,
                       ng_ref, nb_ref, headw_ref, headb_ref,
                       o_ref, x_acc, *, num_heads):
    """Grid = (batch, layer).  One batch element's N tokens, one decoder layer."""
    l = pl.program_id(1)
    last = pl.num_programs(1) - 1
    bf16 = jnp.bfloat16

    # Load the residual stream into the persistent VMEM accumulator on layer 0.
    @pl.when(l == 0)
    def _():
        x_acc[...] = x_ref[...]

    x = x_acc[...]                                  # (N, D) f32
    N, D = x.shape
    hd = D // num_heads

    # ---------------- multi-head self-attention (pre-norm) ----------------
    h = _layernorm(x, n1g_ref[0], n1b_ref[0])       # f32 VPU math
    # Single wide (N, D) x (D, 3D) QKV matmul; bf16 operands, f32 accumulation.
    qkv = jnp.dot(h.astype(bf16), wqkv_ref[0],
                  preferred_element_type=jnp.float32) + bqkv_ref[0]     # (N, 3D)

    # qkv columns are ordered (qkv_index, head, head_dim); 1/sqrt(hd) already folded
    # into the q columns in the wrapper.  Split heads with static lane slices and
    # stack to (H, N, hd) so heads become the batch dim of the attention dots.
    def split_heads(t):                              # (N, D) -> (H, N, hd)
        return jnp.stack([t[:, i * hd:(i + 1) * hd] for i in range(num_heads)], axis=0)

    q = split_heads(qkv[:, 0 * D:1 * D]).astype(bf16)
    k = split_heads(qkv[:, 1 * D:2 * D]).astype(bf16)
    v = split_heads(qkv[:, 2 * D:3 * D]).astype(bf16)

    # scores: 'hqd,hkd->hqk'
    s = jax.lax.dot_general(q, k, (((2,), (2,)), ((0,), (0,))),
                            preferred_element_type=jnp.float32)          # (H, N, N) f32
    m_ = jnp.max(s, axis=-1, keepdims=True)
    e = jnp.exp(s - m_)
    p = e * pl.reciprocal(jnp.sum(e, axis=-1, keepdims=True), approx=True)

    # weighted values: 'hqk,hkd->hqd'
    o = jax.lax.dot_general(p.astype(bf16), v, (((2,), (1,)), ((0,), (0,))),
                            preferred_element_type=jnp.float32)          # (H, N, hd)
    # Concatenate heads (one relayout) then a single wide (N,D)x(D,D) projection.
    o = jnp.concatenate([o[i] for i in range(num_heads)], axis=-1)       # (N, D)
    x = x + jnp.dot(o.astype(bf16), projw_ref[0],
                    preferred_element_type=jnp.float32) + projb_ref[0]

    # ---------------- MLP ----------------
    h = _layernorm(x, n2g_ref[0], n2b_ref[0])
    h = jnp.dot(h.astype(bf16), fc1w_ref[0],
                preferred_element_type=jnp.float32) + fc1b_ref[0]
    h = _gelu(h)
    h = jnp.dot(h.astype(bf16), fc2w_ref[0],
                preferred_element_type=jnp.float32) + fc2b_ref[0]
    x = x + h
    x_acc[...] = x

    # ---------------- final norm + head (lane-dense, 128-padded output) ----------------
    @pl.when(l == last)
    def _():
        xn = _layernorm(x, ng_ref[...], nb_ref[...])
        o_ref[...] = jnp.dot(xn.astype(bf16), headw_ref[...],
                             preferred_element_type=jnp.float32) + headb_ref[...]


def _vmem_limit_bytes():
    """Generation-aware VMEM limit: ~3/4 of physical (96 MiB on v5e/v6e, 48 MiB on v7x)."""
    cap = 64 * 1024 * 1024
    try:
        info = pltpu.get_tpu_info()
        cap = int(getattr(info, "vmem_capacity_bytes", cap) or cap)
    except Exception:
        pass
    return int(cap * 3 // 4)


def vit_decoder_forward(x, params, *, depth, num_heads):
    B, N, D = x.shape
    hd = D // num_heads
    scale = hd ** (-0.5)
    out_dim = params["head_w"].shape[1]
    out_pad = ((out_dim + 127) // 128) * 128     # lane-dense output width
    bf16 = jnp.bfloat16

    # ---- wrapper-side packing (layout plumbing + bf16 casts, outside the kernel) ----
    # Fold the attention scale into the q columns of the QKV weight and bias.
    qkv_w = params["qkv_w"].at[:, :, 0:D].multiply(scale)
    qkv_b = params["qkv_b"].at[:, :, 0:D].multiply(scale)
    headw = jnp.pad(params["head_w"], ((0, 0), (0, out_pad - out_dim))).astype(bf16)
    headb = jnp.pad(params["head_b"], ((0, 0), (0, out_pad - out_dim)))

    plist = [params["n1_g"], params["n1_b"],
             qkv_w.astype(bf16), qkv_b,
             params["proj_w"].astype(bf16), params["proj_b"],
             params["n2_g"], params["n2_b"],
             params["fc1_w"].astype(bf16), params["fc1_b"],
             params["fc2_w"].astype(bf16), params["fc2_b"],
             params["norm_g"], params["norm_b"],
             headw, headb]
    # Which plist entries carry a leading depth axis (per-layer weight pipelining).
    per_layer = set(range(12))

    x2d = x.reshape(B * N, D)

    in_specs = [pl.BlockSpec((N, D), lambda b, l: (b, 0))]
    for idx, p in enumerate(plist):
        nd = p.ndim
        if idx in per_layer:
            # One layer's weights per grid step along the "arbitrary" depth axis:
            # layer l+1 weights prefetch behind layer l compute.
            in_specs.append(pl.BlockSpec((1,) + p.shape[1:],
                                         lambda b, l, _nd=nd: (l,) + (0,) * (_nd - 1)))
        else:
            in_specs.append(pl.BlockSpec(p.shape, lambda b, l, _nd=nd: (0,) * _nd))

    kernel = functools.partial(vit_decoder_kernel, num_heads=num_heads)
    out2d = pl.pallas_call(
        kernel,
        out_shape=jax.ShapeDtypeStruct((B * N, out_pad), jnp.float32),
        grid_spec=pltpu.PrefetchScalarGridSpec(
            num_scalar_prefetch=0,
            grid=(B, depth),                     # batch "parallel", depth "arbitrary" (last)
            in_specs=in_specs,
            out_specs=pl.BlockSpec((N, out_pad), lambda b, l: (b, 0)),
            scratch_shapes=[pltpu.VMEM((N, D), jnp.float32)],   # resident residual stream
        ),
        compiler_params=pltpu.CompilerParams(
            dimension_semantics=("parallel", "arbitrary"),
            vmem_limit_bytes=_vmem_limit_bytes(),
        ),
    )(x2d, *plist)

    return out2d[:, :out_dim].reshape(B, N, out_dim)


# ---------------- deterministic parameter init (synthetic) ----------------
def init_params(key, *, depth, embed_dim, mlp_ratio, out_dim):
    D = embed_dim
    H = int(D * mlp_ratio)
    ks = iter(jax.random.split(key, 64))

    def w(shape):
        return (0.02 * jax.random.normal(next(ks), shape)).astype(jnp.float32)

    params = {
        "n1_g": jnp.ones((depth, 1, D), jnp.float32),
        "n1_b": jnp.zeros((depth, 1, D), jnp.float32),
        "qkv_w": w((depth, D, 3 * D)),
        "qkv_b": w((depth, 1, 3 * D)),
        "proj_w": w((depth, D, D)),
        "proj_b": w((depth, 1, D)),
        "n2_g": jnp.ones((depth, 1, D), jnp.float32),
        "n2_b": jnp.zeros((depth, 1, D), jnp.float32),
        "fc1_w": w((depth, D, H)),
        "fc1_b": w((depth, 1, H)),
        "fc2_w": w((depth, H, D)),
        "fc2_b": w((depth, 1, D)),
        "norm_g": jnp.ones((1, D), jnp.float32),
        "norm_b": jnp.zeros((1, D), jnp.float32),
        "head_w": w((D, out_dim)),
        "head_b": w((1, out_dim)),
    }
    return params


# ---------------- pure-JAX reference (mirrors the PyTorch forward, f32) ----------------
def reference_forward(x, params, *, depth, num_heads):
    B, N, D = x.shape
    hd = D // num_heads
    scale = hd ** (-0.5)
    for l in range(depth):
        h = _layernorm(x, params["n1_g"][l], params["n1_b"][l])
        qkv = h @ params["qkv_w"][l] + params["qkv_b"][l]
        qkv = qkv.reshape(B, N, 3, num_heads, hd).transpose(2, 0, 3, 1, 4)
        q, k, v = qkv[0], qkv[1], qkv[2]
        attn = jax.nn.softmax(jnp.einsum("bhnd,bhmd->bhnm", q, k) * scale, axis=-1)
        o = jnp.einsum("bhnm,bhmd->bhnd", attn, v).transpose(0, 2, 1, 3).reshape(B, N, D)
        x = x + (o @ params["proj_w"][l] + params["proj_b"][l])
        h = _layernorm(x, params["n2_g"][l], params["n2_b"][l])
        h = _gelu(h @ params["fc1_w"][l] + params["fc1_b"][l])
        x = x + (h @ params["fc2_w"][l] + params["fc2_b"][l])
    x = _layernorm(x, params["norm_g"], params["norm_b"])
    return x @ params["head_w"] + params["head_b"]


if __name__ == "__main__":
    # Small shapes consistent with the module: embed_dim=32, depth=2, heads=4,
    # patch_size=4 -> out_dim = 4*4*3 = 48; batch=2, seq=8 tokens.
    B, N, D = 2, 8, 32
    depth, num_heads, mlp_ratio = 2, 4, 4.0
    patch_size = 4
    out_dim = patch_size * patch_size * 3

    key = jax.random.PRNGKey(0)
    kx, kp = jax.random.split(key)
    x = jax.random.normal(kx, (B, N, D), dtype=jnp.float32)
    params = init_params(kp, depth=depth, embed_dim=D, mlp_ratio=mlp_ratio, out_dim=out_dim)

    out = vit_decoder_forward(x, params, depth=depth, num_heads=num_heads)
    out = jax.block_until_ready(out)

    ref = reference_forward(x, params, depth=depth, num_heads=num_heads)
    assert out.shape == (B, N, out_dim), out.shape
    # bf16 MXU operands introduce ~2^-9 relative error per matmul vs the f32 reference;
    # tolerance chosen accordingly (exact math path — LN/softmax/residual — stays f32).
    err = float(jnp.max(jnp.abs(out - ref)))
    assert jnp.allclose(out, ref, atol=1e-2, rtol=1e-2), err

    print("KERNEL_OK")
</pallas_src>

<mosaic_0001>
module attributes {stable_mosaic.version = 11 : i64} {
  func.func @vit_decoder_kernel(%arg0: i32, %arg1: i32, %arg2: memref<8x32xf32, #tpu.memory_space<vmem>>, %arg3: memref<1x1x32xf32, #tpu.memory_space<vmem>>, %arg4: memref<1x1x32xf32, #tpu.memory_space<vmem>>, %arg5: memref<1x32x96xbf16, #tpu.memory_space<vmem>>, %arg6: memref<1x1x96xf32, #tpu.memory_space<vmem>>, %arg7: memref<1x32x32xbf16, #tpu.memory_space<vmem>>, %arg8: memref<1x1x32xf32, #tpu.memory_space<vmem>>, %arg9: memref<1x1x32xf32, #tpu.memory_space<vmem>>, %arg10: memref<1x1x32xf32, #tpu.memory_space<vmem>>, %arg11: memref<1x32x128xbf16, #tpu.memory_space<vmem>>, %arg12: memref<1x1x128xf32, #tpu.memory_space<vmem>>, %arg13: memref<1x128x32xbf16, #tpu.memory_space<vmem>>, %arg14: memref<1x1x32xf32, #tpu.memory_space<vmem>>, %arg15: memref<1x32xf32, #tpu.memory_space<vmem>>, %arg16: memref<1x32xf32, #tpu.memory_space<vmem>>, %arg17: memref<32x128xbf16, #tpu.memory_space<vmem>>, %arg18: memref<1x128xf32, #tpu.memory_space<vmem>>, %arg19: memref<8x128xf32, #tpu.memory_space<vmem>>, %arg20: memref<8x32xf32, #tpu.memory_space<vmem>>) attributes {dimension_semantics = [#tpu.dimension_semantics<parallel>, #tpu.dimension_semantics<arbitrary>], iteration_bounds = array<i64: 2, 2>, scalar_prefetch = 0 : i64, scratch_operands = 1 : i64, tpu.core_type = #tpu.core_type<tc>, window_params = [{transform_indices = @transform_0, window_bounds = array<i64: 8, 32>}, {transform_indices = @transform_1, window_bounds = array<i64: 1, 1, 32>}, {transform_indices = @transform_2, window_bounds = array<i64: 1, 1, 32>}, {transform_indices = @transform_3, window_bounds = array<i64: 1, 32, 96>}, {transform_indices = @transform_4, window_bounds = array<i64: 1, 1, 96>}, {transform_indices = @transform_5, window_bounds = array<i64: 1, 32, 32>}, {transform_indices = @transform_6, window_bounds = array<i64: 1, 1, 32>}, {transform_indices = @transform_7, window_bounds = array<i64: 1, 1, 32>}, {transform_indices = @transform_8, window_bounds = array<i64: 1, 1, 32>}, {transform_indices = @transform_9, window_bounds = array<i64: 1, 32, 128>}, {transform_indices = @transform_10, window_bounds = array<i64: 1, 1, 128>}, {transform_indices = @transform_11, window_bounds = array<i64: 1, 128, 32>}, {transform_indices = @transform_12, window_bounds = array<i64: 1, 1, 32>}, {pipeline_mode = #tpu.pipeline_mode<synchronous>, transform_indices = @transform_13, window_bounds = array<i64: 1, 32>}, {pipeline_mode = #tpu.pipeline_mode<synchronous>, transform_indices = @transform_14, window_bounds = array<i64: 1, 32>}, {pipeline_mode = #tpu.pipeline_mode<synchronous>, transform_indices = @transform_15, window_bounds = array<i64: 32, 128>}, {pipeline_mode = #tpu.pipeline_mode<synchronous>, transform_indices = @transform_16, window_bounds = array<i64: 1, 128>}, {transform_indices = @transform_17, window_bounds = array<i64: 8, 128>}]} {
    %c0_i32 = arith.constant 0 : i32
    %0 = arith.cmpi eq, %arg1, %c0_i32 : i32
    %1 = arith.extui %0 : i1 to i32
    %c0_i32_0 = arith.constant 0 : i32
    %2 = arith.cmpi ne, %1, %c0_i32_0 : i32
    scf.if %2 {
      %c0_61 = arith.constant 0 : index
      %c0_62 = arith.constant 0 : index
      %157 = vector.load %arg2[%c0_61, %c0_62] : memref<8x32xf32, #tpu.memory_space<vmem>>, vector<8x32xf32>
      %c0_63 = arith.constant 0 : index
      %c0_64 = arith.constant 0 : index
      %158 = vector.load %arg20[%c0_63, %c0_64] : memref<8x32xf32, #tpu.memory_space<vmem>>, vector<8x32xf32>
      tpu.vector_store %arg20[%c0_63, %c0_64], %157 {strides = array<i32>} : memref<8x32xf32, #tpu.memory_space<vmem>>, vector<8x32xf32>,
    } else {
    }
    %c0 = arith.constant 0 : index
    %c0_1 = arith.constant 0 : index
    %3 = vector.load %arg20[%c0, %c0_1] : memref<8x32xf32, #tpu.memory_space<vmem>>, vector<8x32xf32>
    %c0_2 = arith.constant 0 : index
    %c0_3 = arith.constant 0 : index
    %c0_4 = arith.constant 0 : index
    %4 = vector.load %arg3[%c0_2, %c0_3, %c0_4] : memref<1x1x32xf32, #tpu.memory_space<vmem>>, vector<1x1x32xf32>
    %5 = vector.shape_cast %4 : vector<1x1x32xf32> to vector<1x32xf32>
    %c0_5 = arith.constant 0 : index
    %c0_6 = arith.constant 0 : index
    %c0_7 = arith.constant 0 : index
    %6 = vector.load %arg4[%c0_5, %c0_6, %c0_7] : memref<1x1x32xf32, #tpu.memory_space<vmem>>, vector<1x1x32xf32>
    %7 = vector.shape_cast %6 : vector<1x1x32xf32> to vector<1x32xf32>
    %cst = arith.constant dense<0.000000e+00> : vector<8xf32>
    %8 = vector.multi_reduction <add>, %3, %cst [1] : vector<8x32xf32> to vector<8xf32>
    %9 = vector.shape_cast %8 : vector<8xf32> to vector<8x1xf32>
    %cst_8 = arith.constant 3.200000e+01 : f32
    %10 = vector.broadcast %cst_8 : f32 to vector<8x1xf32>
    %11 = arith.divf %9, %10 : vector<8x1xf32>
    %12 = vector.broadcast %11 : vector<8x1xf32> to vector<8x32xf32>
    %13 = arith.subf %3, %12 : vector<8x32xf32>
    %14 = arith.mulf %13, %13 : vector<8x32xf32>
    %cst_9 = arith.constant dense<0.000000e+00> : vector<8xf32>
    %15 = vector.multi_reduction <add>, %14, %cst_9 [1] : vector<8x32xf32> to vector<8xf32>
    %16 = vector.shape_cast %15 : vector<8xf32> to vector<8x1xf32>
    %cst_10 = arith.constant 3.200000e+01 : f32
    %17 = vector.broadcast %cst_10 : f32 to vector<8x1xf32>
    %18 = arith.divf %16, %17 : vector<8x1xf32>
    %19 = vector.broadcast %11 : vector<8x1xf32> to vector<8x32xf32>
    %20 = arith.subf %3, %19 : vector<8x32xf32>
    %cst_11 = arith.constant 9.99999974E-6 : f32
    %21 = vector.broadcast %cst_11 : f32 to vector<8x1xf32>
    %22 = arith.addf %18, %21 : vector<8x1xf32>
    %23 = math.rsqrt %22 : vector<8x1xf32>
    %24 = vector.broadcast %23 : vector<8x1xf32> to vector<8x32xf32>
    %25 = arith.mulf %20, %24 : vector<8x32xf32>
    %26 = vector.broadcast %5 : vector<1x32xf32> to vector<8x32xf32>
    %27 = arith.mulf %25, %26 : vector<8x32xf32>
    %28 = vector.broadcast %7 : vector<1x32xf32> to vector<8x32xf32>
    %29 = arith.addf %27, %28 : vector<8x32xf32>
    %30 = arith.truncf %29 : vector<8x32xf32> to vector<8x32xbf16>
    %c0_12 = arith.constant 0 : index
    %c0_13 = arith.constant 0 : index
    %c0_14 = arith.constant 0 : index
    %31 = vector.load %arg5[%c0_12, %c0_13, %c0_14] : memref<1x32x96xbf16, #tpu.memory_space<vmem>>, vector<1x32x96xbf16>
    %32 = vector.shape_cast %31 : vector<1x32x96xbf16> to vector<32x96xbf16>
    %cst_15 = arith.constant dense<0.000000e+00> : vector<8x96xf32>
    %33 = tpu.matmul %30, %32, %cst_15 {dimension_numbers = #tpu.dot_dimension_numbers<[1], [0], [0], [1], [0, 0, 1, 1], [], []>} : vector<8x32xbf16>, vector<32x96xbf16>, vector<8x96xf32> -> vector<8x96xf32>
    %c0_16 = arith.constant 0 : index
    %c0_17 = arith.constant 0 : index
    %c0_18 = arith.constant 0 : index
    %34 = vector.load %arg6[%c0_16, %c0_17, %c0_18] : memref<1x1x96xf32, #tpu.memory_space<vmem>>, vector<1x1x96xf32>
    %35 = vector.shape_cast %34 : vector<1x1x96xf32> to vector<1x96xf32>
    %36 = vector.broadcast %35 : vector<1x96xf32> to vector<8x96xf32>
    %37 = arith.addf %33, %36 : vector<8x96xf32>
    %38 = vector.extract_strided_slice %37 {offsets = [0, 0], sizes = [8, 32], strides = [1, 1]} : vector<8x96xf32> to vector<8x32xf32>
    %39 = vector.extract_strided_slice %38 {offsets = [0, 0], sizes = [8, 8], strides = [1, 1]} : vector<8x32xf32> to vector<8x8xf32>
    %40 = vector.extract_strided_slice %38 {offsets = [0, 8], sizes = [8, 8], strides = [1, 1]} : vector<8x32xf32> to vector<8x8xf32>
    %41 = vector.extract_strided_slice %38 {offsets = [0, 16], sizes = [8, 8], strides = [1, 1]} : vector<8x32xf32> to vector<8x8xf32>
    %42 = vector.extract_strided_slice %38 {offsets = [0, 24], sizes = [8, 8], strides = [1, 1]} : vector<8x32xf32> to vector<8x8xf32>
    %43 = vector.shape_cast %39 : vector<8x8xf32> to vector<1x8x8xf32>
    %44 = vector.shape_cast %40 : vector<8x8xf32> to vector<1x8x8xf32>
    %45 = vector.shape_cast %41 : vector<8x8xf32> to vector<1x8x8xf32>
    %46 = vector.shape_cast %42 : vector<8x8xf32> to vector<1x8x8xf32>
    %47 = tpu.concatenate %43, %44, %45, %46 in 0 : vector<1x8x8xf32>, vector<1x8x8xf32>, vector<1x8x8xf32>, vector<1x8x8xf32> -> vector<4x8x8xf32>
    %48 = arith.truncf %47 : vector<4x8x8xf32> to vector<4x8x8xbf16>
    %49 = vector.extract_strided_slice %37 {offsets = [0, 32], sizes = [8, 32], strides = [1, 1]} : vector<8x96xf32> to vector<8x32xf32>
    %50 = vector.extract_strided_slice %49 {offsets = [0, 0], sizes = [8, 8], strides = [1, 1]} : vector<8x32xf32> to vector<8x8xf32>
    %51 = vector.extract_strided_slice %49 {offsets = [0, 8], sizes = [8, 8], strides = [1, 1]} : vector<8x32xf32> to vector<8x8xf32>
    %52 = vector.extract_strided_slice %49 {offsets = [0, 16], sizes = [8, 8], strides = [1, 1]} : vector<8x32xf32> to vector<8x8xf32>
    %53 = vector.extract_strided_slice %49 {offsets = [0, 24], sizes = [8, 8], strides = [1, 1]} : vector<8x32xf32> to vector<8x8xf32>
    %54 = vector.shape_cast %50 : vector<8x8xf32> to vector<1x8x8xf32>
    %55 = vector.shape_cast %51 : vector<8x8xf32> to vector<1x8x8xf32>
    %56 = vector.shape_cast %52 : vector<8x8xf32> to vector<1x8x8xf32>
    %57 = vector.shape_cast %53 : vector<8x8xf32> to vector<1x8x8xf32>
    %58 = tpu.concatenate %54, %55, %56, %57 in 0 : vector<1x8x8xf32>, vector<1x8x8xf32>, vector<1x8x8xf32>, vector<1x8x8xf32> -> vector<4x8x8xf32>
    %59 = arith.truncf %58 : vector<4x8x8xf32> to vector<4x8x8xbf16>
    %60 = vector.extract_strided_slice %37 {offsets = [0, 64], sizes = [8, 32], strides = [1, 1]} : vector<8x96xf32> to vector<8x32xf32>
    %61 = vector.extract_strided_slice %60 {offsets = [0, 0], sizes = [8, 8], strides = [1, 1]} : vector<8x32xf32> to vector<8x8xf32>
    %62 = vector.extract_strided_slice %60 {offsets = [0, 8], sizes = [8, 8], strides = [1, 1]} : vector<8x32xf32> to vector<8x8xf32>
    %63 = vector.extract_strided_slice %60 {offsets = [0, 16], sizes = [8, 8], strides = [1, 1]} : vector<8x32xf32> to vector<8x8xf32>
    %64 = vector.extract_strided_slice %60 {offsets = [0, 24], sizes = [8, 8], strides = [1, 1]} : vector<8x32xf32> to vector<8x8xf32>
    %65 = vector.shape_cast %61 : vector<8x8xf32> to vector<1x8x8xf32>
    %66 = vector.shape_cast %62 : vector<8x8xf32> to vector<1x8x8xf32>
    %67 = vector.shape_cast %63 : vector<8x8xf32> to vector<1x8x8xf32>
    %68 = vector.shape_cast %64 : vector<8x8xf32> to vector<1x8x8xf32>
    %69 = tpu.concatenate %65, %66, %67, %68 in 0 : vector<1x8x8xf32>, vector<1x8x8xf32>, vector<1x8x8xf32>, vector<1x8x8xf32> -> vector<4x8x8xf32>
    %70 = arith.truncf %69 : vector<4x8x8xf32> to vector<4x8x8xbf16>
    %cst_19 = arith.constant dense<0.000000e+00> : vector<4x8x8xf32>
    %71 = tpu.matmul %48, %59, %cst_19 {dimension_numbers = #tpu.dot_dimension_numbers<[2], [2], [1], [1], [0, 0, 0, 1, 1, 1], [0], [0]>} : vector<4x8x8xbf16>, vector<4x8x8xbf16>, vector<4x8x8xf32> -> vector<4x8x8xf32>
    %cst_20 = arith.constant dense<0xFF800000> : vector<4x8xf32>
    %72 = vector.multi_reduction <maximumf>, %71, %cst_20 [2] : vector<4x8x8xf32> to vector<4x8xf32>
    %73 = vector.shape_cast %72 : vector<4x8xf32> to vector<4x8x1xf32>
    %74 = vector.broadcast %73 : vector<4x8x1xf32> to vector<4x8x8xf32>
    %75 = arith.subf %71, %74 : vector<4x8x8xf32>
    %76 = math.exp %75 : vector<4x8x8xf32>
    %cst_21 = arith.constant dense<0.000000e+00> : vector<4x8xf32>
    %77 = vector.multi_reduction <add>, %76, %cst_21 [2] : vector<4x8x8xf32> to vector<4x8xf32>
    %78 = vector.shape_cast %77 : vector<4x8xf32> to vector<4x8x1xf32>
    %79 = tpu.reciprocal %78 {approx = true} : vector<4x8x1xf32> -> vector<4x8x1xf32>
    %80 = vector.broadcast %79 : vector<4x8x1xf32> to vector<4x8x8xf32>
    %81 = arith.mulf %76, %80 : vector<4x8x8xf32>
    %82 = arith.truncf %81 : vector<4x8x8xf32> to vector<4x8x8xbf16>
    %cst_22 = arith.constant dense<0.000000e+00> : vector<4x8x8xf32>
    %83 = tpu.matmul %82, %70, %cst_22 {dimension_numbers = #tpu.dot_dimension_numbers<[2], [1], [1], [2], [0, 0, 0, 1, 1, 2], [0], [0]>} : vector<4x8x8xbf16>, vector<4x8x8xbf16>, vector<4x8x8xf32> -> vector<4x8x8xf32>
    %84 = vector.extract_strided_slice %83 {offsets = [0, 0, 0], sizes = [1, 8, 8], strides = [1, 1, 1]} : vector<4x8x8xf32> to vector<1x8x8xf32>
    %85 = vector.shape_cast %84 : vector<1x8x8xf32> to vector<8x8xf32>
    %86 = vector.extract_strided_slice %83 {offsets = [1, 0, 0], sizes = [1, 8, 8], strides = [1, 1, 1]} : vector<4x8x8xf32> to vector<1x8x8xf32>
    %87 = vector.shape_cast %86 : vector<1x8x8xf32> to vector<8x8xf32>
    %88 = vector.extract_strided_slice %83 {offsets = [2, 0, 0], sizes = [1, 8, 8], strides = [1, 1, 1]} : vector<4x8x8xf32> to vector<1x8x8xf32>
    %89 = vector.shape_cast %88 : vector<1x8x8xf32> to vector<8x8xf32>
    %90 = vector.extract_strided_slice %83 {offsets = [3, 0, 0], sizes = [1, 8, 8], strides = [1, 1, 1]} : vector<4x8x8xf32> to vector<1x8x8xf32>
    %91 = vector.shape_cast %90 : vector<1x8x8xf32> to vector<8x8xf32>
    %92 = tpu.concatenate %85, %87, %89, %91 in 1 : vector<8x8xf32>, vector<8x8xf32>, vector<8x8xf32>, vector<8x8xf32> -> vector<8x32xf32>
    %93 = arith.truncf %92 : vector<8x32xf32> to vector<8x32xbf16>
    %c0_23 = arith.constant 0 : index
    %c0_24 = arith.constant 0 : index
    %c0_25 = arith.constant 0 : index
    %94 = vector.load %arg7[%c0_23, %c0_24, %c0_25] : memref<1x32x32xbf16, #tpu.memory_space<vmem>>, vector<1x32x32xbf16>
    %95 = vector.shape_cast %94 : vector<1x32x32xbf16> to vector<32x32xbf16>
    %cst_26 = arith.constant dense<0.000000e+00> : vector<8x32xf32>
    %96 = tpu.matmul %93, %95, %cst_26 {dimension_numbers = #tpu.dot_dimension_numbers<[1], [0], [0], [1], [0, 0, 1, 1], [], []>} : vector<8x32xbf16>, vector<32x32xbf16>, vector<8x32xf32> -> vector<8x32xf32>
    %97 = arith.addf %3, %96 : vector<8x32xf32>
    %c0_27 = arith.constant 0 : index
    %c0_28 = arith.constant 0 : index
    %c0_29 = arith.constant 0 : index
    %98 = vector.load %arg8[%c0_27, %c0_28, %c0_29] : memref<1x1x32xf32, #tpu.memory_space<vmem>>, vector<1x1x32xf32>
    %99 = vector.shape_cast %98 : vector<1x1x32xf32> to vector<1x32xf32>
    %100 = vector.broadcast %99 : vector<1x32xf32> to vector<8x32xf32>
    %101 = arith.addf %97, %100 : vector<8x32xf32>
    %c0_30 = arith.constant 0 : index
    %c0_31 = arith.constant 0 : index
    %c0_32 = arith.constant 0 : index
    %102 = vector.load %arg9[%c0_30, %c0_31, %c0_32] : memref<1x1x32xf32, #tpu.memory_space<vmem>>, vector<1x1x32xf32>
    %103 = vector.shape_cast %102 : vector<1x1x32xf32> to vector<1x32xf32>
    %c0_33 = arith.constant 0 : index
    %c0_34 = arith.constant 0 : index
    %c0_35 = arith.constant 0 : index
    %104 = vector.load %arg10[%c0_33, %c0_34, %c0_35] : memref<1x1x32xf32, #tpu.memory_space<vmem>>, vector<1x1x32xf32>
    %105 = vector.shape_cast %104 : vector<1x1x32xf32> to vector<1x32xf32>
    %cst_36 = arith.constant dense<0.000000e+00> : vector<8xf32>
    %106 = vector.multi_reduction <add>, %101, %cst_36 [1] : vector<8x32xf32> to vector<8xf32>
    %107 = vector.shape_cast %106 : vector<8xf32> to vector<8x1xf32>
    %cst_37 = arith.constant 3.200000e+01 : f32
    %108 = vector.broadcast %cst_37 : f32 to vector<8x1xf32>
    %109 = arith.divf %107, %108 : vector<8x1xf32>
    %110 = vector.broadcast %109 : vector<8x1xf32> to vector<8x32xf32>
    %111 = arith.subf %101, %110 : vector<8x32xf32>
    %112 = arith.mulf %111, %111 : vector<8x32xf32>
    %cst_38 = arith.constant dense<0.000000e+00> : vector<8xf32>
    %113 = vector.multi_reduction <add>, %112, %cst_38 [1] : vector<8x32xf32> to vector<8xf32>
    %114 = vector.shape_cast %113 : vector<8xf32> to vector<8x1xf32>
    %cst_39 = arith.constant 3.200000e+01 : f32
    %115 = vector.broadcast %cst_39 : f32 to vector<8x1xf32>
    %116 = arith.divf %114, %115 : vector<8x1xf32>
    %117 = vector.broadcast %109 : vector<8x1xf32> to vector<8x32xf32>
    %118 = arith.subf %101, %117 : vector<8x32xf32>
    %cst_40 = arith.constant 9.99999974E-6 : f32
    %119 = vector.broadcast %cst_40 : f32 to vector<8x1xf32>
    %120 = arith.addf %116, %119 : vector<8x1xf32>
    %121 = math.rsqrt %120 : vector<8x1xf32>
    %122 = vector.broadcast %121 : vector<8x1xf32> to vector<8x32xf32>
    %123 = arith.mulf %118, %122 : vector<8x32xf32>
    %124 = vector.broadcast %103 : vector<1x32xf32> to vector<8x32xf32>
    %125 = arith.mulf %123, %124 : vector<8x32xf32>
    %126 = vector.broadcast %105 : vector<1x32xf32> to vector<8x32xf32>
    %127 = arith.addf %125, %126 : vector<8x32xf32>
    %128 = arith.truncf %127 : vector<8x32xf32> to vector<8x32xbf16>
    %c0_41 = arith.constant 0 : index
    %c0_42 = arith.constant 0 : index
    %c0_43 = arith.constant 0 : index
    %129 = vector.load %arg11[%c0_41, %c0_42, %c0_43] : memref<1x32x128xbf16, #tpu.memory_space<vmem>>, vector<1x32x128xbf16>
    %130 = vector.shape_cast %129 : vector<1x32x128xbf16> to vector<32x128xbf16>
    %cst_44 = arith.constant dense<0.000000e+00> : vector<8x128xf32>
    %131 = tpu.matmul %128, %130, %cst_44 {dimension_numbers = #tpu.dot_dimension_numbers<[1], [0], [0], [1], [0, 0, 1, 1], [], []>} : vector<8x32xbf16>, vector<32x128xbf16>, vector<8x128xf32> -> vector<8x128xf32>
    %c0_45 = arith.constant 0 : index
    %c0_46 = arith.constant 0 : index
    %c0_47 = arith.constant 0 : index
    %132 = vector.load %arg12[%c0_45, %c0_46, %c0_47] : memref<1x1x128xf32, #tpu.memory_space<vmem>>, vector<1x1x128xf32>
    %133 = vector.shape_cast %132 : vector<1x1x128xf32> to vector<1x128xf32>
    %134 = vector.broadcast %133 : vector<1x128xf32> to vector<8x128xf32>
    %135 = arith.addf %131, %134 : vector<8x128xf32>
    %cst_48 = arith.constant 5.000000e-01 : f32
    %136 = vector.broadcast %cst_48 : f32 to vector<8x128xf32>
    %137 = arith.mulf %136, %135 : vector<8x128xf32>
    %cst_49 = arith.constant 0.707106769 : f32
    %138 = vector.broadcast %cst_49 : f32 to vector<8x128xf32>
    %139 = arith.mulf %135, %138 : vector<8x128xf32>
    %140 = math.erf %139 : vector<8x128xf32>
    %cst_50 = arith.constant 1.000000e+00 : f32
    %141 = vector.broadcast %cst_50 : f32 to vector<8x128xf32>
    %142 = arith.addf %141, %140 : vector<8x128xf32>
    %143 = arith.mulf %137, %142 : vector<8x128xf32>
    %144 = arith.truncf %143 : vector<8x128xf32> to vector<8x128xbf16>
    %c0_51 = arith.constant 0 : index
    %c0_52 = arith.constant 0 : index
    %c0_53 = arith.constant 0 : index
    %145 = vector.load %arg13[%c0_51, %c0_52, %c0_53] : memref<1x128x32xbf16, #tpu.memory_space<vmem>>, vector<1x128x32xbf16>
    %146 = vector.shape_cast %145 : vector<1x128x32xbf16> to vector<128x32xbf16>
    %cst_54 = arith.constant dense<0.000000e+00> : vector<8x32xf32>
    %147 = tpu.matmul %144, %146, %cst_54 {dimension_numbers = #tpu.dot_dimension_numbers<[1], [0], [0], [1], [0, 0, 1, 1], [], []>} : vector<8x128xbf16>, vector<128x32xbf16>, vector<8x32xf32> -> vector<8x32xf32>
    %c0_55 = arith.constant 0 : index
    %c0_56 = arith.constant 0 : index
    %c0_57 = arith.constant 0 : index
    %148 = vector.load %arg14[%c0_55, %c0_56, %c0_57] : memref<1x1x32xf32, #tpu.memory_space<vmem>>, vector<1x1x32xf32>
    %149 = vector.shape_cast %148 : vector<1x1x32xf32> to vector<1x32xf32>
    %150 = vector.broadcast %149 : vector<1x32xf32> to vector<8x32xf32>
    %151 = arith.addf %147, %150 : vector<8x32xf32>
    %152 = arith.addf %101, %151 : vector<8x32xf32>
    %c0_58 = arith.constant 0 : index
    %c0_59 = arith.constant 0 : index
    %153 = vector.load %arg20[%c0_58, %c0_59] : memref<8x32xf32, #tpu.memory_space<vmem>>, vector<8x32xf32>
    tpu.vector_store %arg20[%c0_58, %c0_59], %152 {strides = array<i32>} : memref<8x32xf32, #tpu.memory_space<vmem>>, vector<8x32xf32>,
    %c1_i32 = arith.constant 1 : i32
    %154 = arith.cmpi eq, %arg1, %c1_i32 : i32
    %155 = arith.extui %154 : i1 to i32
    %c0_i32_60 = arith.constant 0 : i32
    %156 = arith.cmpi ne, %155, %c0_i32_60 : i32
    scf.if %156 {
      %c0_61 = arith.constant 0 : index
      %c0_62 = arith.constant 0 : index
      %157 = vector.load %arg15[%c0_61, %c0_62] : memref<1x32xf32, #tpu.memory_space<vmem>>, vector<1x32xf32>
      %c0_63 = arith.constant 0 : index
      %c0_64 = arith.constant 0 : index
      %158 = vector.load %arg16[%c0_63, %c0_64] : memref<1x32xf32, #tpu.memory_space<vmem>>, vector<1x32xf32>
      %cst_65 = arith.constant dense<0.000000e+00> : vector<8xf32>
      %159 = vector.multi_reduction <add>, %152, %cst_65 [1] : vector<8x32xf32> to vector<8xf32>
      %160 = vector.shape_cast %159 : vector<8xf32> to vector<8x1xf32>
      %cst_66 = arith.constant 3.200000e+01 : f32
      %161 = vector.broadcast %cst_66 : f32 to vector<8x1xf32>
      %162 = arith.divf %160, %161 : vector<8x1xf32>
      %163 = vector.broadcast %162 : vector<8x1xf32> to vector<8x32xf32>
      %164 = arith.subf %152, %163 : vector<8x32xf32>
      %165 = arith.mulf %164, %164 : vector<8x32xf32>
      %cst_67 = arith.constant dense<0.000000e+00> : vector<8xf32>
      %166 = vector.multi_reduction <add>, %165, %cst_67 [1] : vector<8x32xf32> to vector<8xf32>
      %167 = vector.shape_cast %166 : vector<8xf32> to vector<8x1xf32>
      %cst_68 = arith.constant 3.200000e+01 : f32
      %168 = vector.broadcast %cst_68 : f32 to vector<8x1xf32>
      %169 = arith.divf %167, %168 : vector<8x1xf32>
      %170 = vector.broadcast %162 : vector<8x1xf32> to vector<8x32xf32>
      %171 = arith.subf %152, %170 : vector<8x32xf32>
      %cst_69 = arith.constant 9.99999974E-6 : f32
      %172 = vector.broadcast %cst_69 : f32 to vector<8x1xf32>
      %173 = arith.addf %169, %172 : vector<8x1xf32>
      %174 = math.rsqrt %173 : vector<8x1xf32>
      %175 = vector.broadcast %174 : vector<8x1xf32> to vector<8x32xf32>
      %176 = arith.mulf %171, %175 : vector<8x32xf32>
      %177 = vector.broadcast %157 : vector<1x32xf32> to vector<8x32xf32>
      %178 = arith.mulf %176, %177 : vector<8x32xf32>
      %179 = vector.broadcast %158 : vector<1x32xf32> to vector<8x32xf32>
      %180 = arith.addf %178, %179 : vector<8x32xf32>
      %181 = arith.truncf %180 : vector<8x32xf32> to vector<8x32xbf16>
      %c0_70 = arith.constant 0 : index
      %c0_71 = arith.constant 0 : index
      %182 = vector.load %arg17[%c0_70, %c0_71] : memref<32x128xbf16, #tpu.memory_space<vmem>>, vector<32x128xbf16>
      %cst_72 = arith.constant dense<0.000000e+00> : vector<8x128xf32>
      %183 = tpu.matmul %181, %182, %cst_72 {dimension_numbers = #tpu.dot_dimension_numbers<[1], [0], [0], [1], [0, 0, 1, 1], [], []>} : vector<8x32xbf16>, vector<32x128xbf16>, vector<8x128xf32> -> vector<8x128xf32>
      %c0_73 = arith.constant 0 : index
      %c0_74 = arith.constant 0 : index
      %184 = vector.load %arg18[%c0_73, %c0_74] : memref<1x128xf32, #tpu.memory_space<vmem>>, vector<1x128xf32>
      %185 = vector.broadcast %184 : vector<1x128xf32> to vector<8x128xf32>
      %186 = arith.addf %183, %185 : vector<8x128xf32>
      %c0_75 = arith.constant 0 : index
      %c0_76 = arith.constant 0 : index
      %187 = vector.load %arg19[%c0_75, %c0_76] : memref<8x128xf32, #tpu.memory_space<vmem>>, vector<8x128xf32>
      tpu.vector_store %arg19[%c0_75, %c0_76], %186 {strides = array<i32>} : memref<8x128xf32, #tpu.memory_space<vmem>>, vector<8x128xf32>,
    } else {
    }
    return
  }
  func.func @transform_0(%arg0: i32, %arg1: i32) -> (i32, i32) {
    %c0_i32 = arith.constant 0 : i32
    %c0_i32_0 = arith.constant 0 : i32
    return %arg0, %c0_i32 : i32, i32
  }
  func.func @transform_1(%arg0: i32, %arg1: i32) -> (i32, i32, i32) {
    %c0_i32 = arith.constant 0 : i32
    %c0_i32_0 = arith.constant 0 : i32
    %c0_i32_1 = arith.constant 0 : i32
    return %arg1, %c0_i32, %c0_i32_0 : i32, i32, i32
  }
  func.func @transform_2(%arg0: i32, %arg1: i32) -> (i32, i32, i32) {
    %c0_i32 = arith.constant 0 : i32
    %c0_i32_0 = arith.constant 0 : i32
    %c0_i32_1 = arith.constant 0 : i32
    return %arg1, %c0_i32, %c0_i32_0 : i32, i32, i32
  }
  func.func @transform_3(%arg0: i32, %arg1: i32) -> (i32, i32, i32) {
    %c0_i32 = arith.constant 0 : i32
    %c0_i32_0 = arith.constant 0 : i32
    %c0_i32_1 = arith.constant 0 : i32
    return %arg1, %c0_i32, %c0_i32_0 : i32, i32, i32
  }
  func.func @transform_4(%arg0: i32, %arg1: i32) -> (i32, i32, i32) {
    %c0_i32 = arith.constant 0 : i32
    %c0_i32_0 = arith.constant 0 : i32
    %c0_i32_1 = arith.constant 0 : i32
    return %arg1, %c0_i32, %c0_i32_0 : i32, i32, i32
  }
  func.func @transform_5(%arg0: i32, %arg1: i32) -> (i32, i32, i32) {
    %c0_i32 = arith.constant 0 : i32
    %c0_i32_0 = arith.constant 0 : i32
    %c0_i32_1 = arith.constant 0 : i32
    return %arg1, %c0_i32, %c0_i32_0 : i32, i32, i32
  }
  func.func @transform_6(%arg0: i32, %arg1: i32) -> (i32, i32, i32) {
    %c0_i32 = arith.constant 0 : i32
    %c0_i32_0 = arith.constant 0 : i32
    %c0_i32_1 = arith.constant 0 : i32
    return %arg1, %c0_i32, %c0_i32_0 : i32, i32, i32
  }
  func.func @transform_7(%arg0: i32, %arg1: i32) -> (i32, i32, i32) {
    %c0_i32 = arith.constant 0 : i32
    %c0_i32_0 = arith.constant 0 : i32
    %c0_i32_1 = arith.constant 0 : i32
    return %arg1, %c0_i32, %c0_i32_0 : i32, i32, i32
  }
  func.func @transform_8(%arg0: i32, %arg1: i32) -> (i32, i32, i32) {
    %c0_i32 = arith.constant 0 : i32
    %c0_i32_0 = arith.constant 0 : i32
    %c0_i32_1 = arith.constant 0 : i32
    return %arg1, %c0_i32, %c0_i32_0 : i32, i32, i32
  }
  func.func @transform_9(%arg0: i32, %arg1: i32) -> (i32, i32, i32) {
    %c0_i32 = arith.constant 0 : i32
    %c0_i32_0 = arith.constant 0 : i32
    %c0_i32_1 = arith.constant 0 : i32
    return %arg1, %c0_i32, %c0_i32_0 : i32, i32, i32
  }
  func.func @transform_10(%arg0: i32, %arg1: i32) -> (i32, i32, i32) {
    %c0_i32 = arith.constant 0 : i32
    %c0_i32_0 = arith.constant 0 : i32
    %c0_i32_1 = arith.constant 0 : i32
    return %arg1, %c0_i32, %c0_i32_0 : i32, i32, i32
  }
  func.func @transform_11(%arg0: i32, %arg1: i32) -> (i32, i32, i32) {
    %c0_i32 = arith.constant 0 : i32
    %c0_i32_0 = arith.constant 0 : i32
    %c0_i32_1 = arith.constant 0 : i32
    return %arg1, %c0_i32, %c0_i32_0 : i32, i32, i32
  }
  func.func @transform_12(%arg0: i32, %arg1: i32) -> (i32, i32, i32) {
    %c0_i32 = arith.constant 0 : i32
    %c0_i32_0 = arith.constant 0 : i32
    %c0_i32_1 = arith.constant 0 : i32
    return %arg1, %c0_i32, %c0_i32_0 : i32, i32, i32
  }
  func.func @transform_13(%arg0: i32, %arg1: i32) -> (i32, i32) {
    %c0_i32 = arith.constant 0 : i32
    %c0_i32_0 = arith.constant 0 : i32
    %c0_i32_1 = arith.constant 0 : i32
    return %c0_i32, %c0_i32_0 : i32, i32
  }
  func.func @transform_14(%arg0: i32, %arg1: i32) -> (i32, i32) {
    %c0_i32 = arith.constant 0 : i32
    %c0_i32_0 = arith.constant 0 : i32
    %c0_i32_1 = arith.constant 0 : i32
    return %c0_i32, %c0_i32_0 : i32, i32
  }
  func.func @transform_15(%arg0: i32, %arg1: i32) -> (i32, i32) {
    %c0_i32 = arith.constant 0 : i32
    %c0_i32_0 = arith.constant 0 : i32
    %c0_i32_1 = arith.constant 0 : i32
    return %c0_i32, %c0_i32_0 : i32, i32
  }
  func.func @transform_16(%arg0: i32, %arg1: i32) -> (i32, i32) {
    %c0_i32 = arith.constant 0 : i32
    %c0_i32_0 = arith.constant 0 : i32
    %c0_i32_1 = arith.constant 0 : i32
    return %c0_i32, %c0_i32_0 : i32, i32
  }
  func.func @transform_17(%arg0: i32, %arg1: i32) -> (i32, i32) {
    %c0_i32 = arith.constant 0 : i32
    %c0_i32_0 = arith.constant 0 : i32
    return %arg0, %c0_i32 : i32, i32
  }
}

</mosaic_0001>

<bundles_post_ra>
// kernel: tpu_custom_call.1
= control target key start
LH: loop header
LB: loop body
LE: loop exit
PB: predicated region body
PF: predicated region fallthrough
CT: control target
= control target key end

     0   :  { %s2813_s0 = inlined_call_operand.vmem [shape: f32[16,32], index: 0, kind: input, shape index: {}]   ;;  %s2814_s1 = inlined_call_operand.vmem [shape: f32[2,1,32], index: 1, kind: input, shape index: {}]   ;;  %s2815_s2 = inlined_call_operand.vmem [shape: f32[2,1,32], index: 2, kind: input, shape index: {}]   ;;  %s2816_s3 = inlined_call_operand.vmem [shape: bf16[2,32,96], index: 3, kind: input, shape index: {}]   ;;  %s2817_s4 = inlined_call_operand.vmem [shape: f32[2,1,96], index: 4, kind: input, shape index: {}]   ;;  %s2818_s5 = inlined_call_operand.vmem [shape: bf16[2,32,32], index: 5, kind: input, shape index: {}]   ;;  %s2819_s6 = inlined_call_operand.vmem [shape: f32[2,1,32], index: 6, kind: input, shape index: {}]   ;;  %s2820_s7 = inlined_call_operand.vmem [shape: f32[2,1,32], index: 7, kind: input, shape index: {}]   ;;  %s2821_s8 = inlined_call_operand.vmem [shape: f32[2,1,32], index: 8, kind: input, shape index: {}]   ;;  %s2822_s9 = inlined_call_operand.vmem [shape: bf16[2,32,128], index: 9, kind: input, shape index: {}]   ;;  %s2823_s10 = inlined_call_operand.vmem [shape: f32[2,1,128], index: 10, kind: input, shape index: {}]   ;;  %s2824_s11 = inlined_call_operand.vmem [shape: bf16[2,128,32], index: 11, kind: input, shape index: {}]   ;;  %s2825_s12 = inlined_call_operand.vmem [shape: f32[2,1,32], index: 12, kind: input, shape index: {}]   ;;  %s2826_s13 = inlined_call_operand.vmem [shape: f32[1,32], index: 13, kind: input, shape index: {}]   ;;  %s2827_s14 = inlined_call_operand.vmem [shape: f32[1,32], index: 14, kind: input, shape index: {}]   ;;  %s2828_s15 = inlined_call_operand.vmem [shape: bf16[32,128], index: 15, kind: input, shape index: {}]   ;;  %s2829_s16 = inlined_call_operand.vmem [shape: f32[1,128], index: 16, kind: input, shape index: {}]   ;;  %s2830_s17 = inlined_call_operand.hbm [shape: f32[16,128], index: 17, kind: output, shape index: {}]  }
   0x1   :  { %2847 = sst [smem:[#allocation19_spill]] %s2813_s0 }
   0x2   :  { %2848 = sst [smem:[#allocation20_spill]] %s2814_s1 }
   0x3   :  { %2849 = sst [smem:[#allocation21_spill]] %s2816_s3 }
   0x4   :  { %2850 = sst [smem:[#allocation22_spill]] %s2818_s5 }
   0x5   :  { %2851 = sst [smem:[#allocation23_spill]] %s2826_s13 }
   0x6   :  { %2852 = sst [smem:[#allocation24_spill]] %s2827_s14 }
   0x7   :  { %2853 = sst [smem:[#allocation25_spill]] %s2828_s15 }
   0x8   :  { %2854 = sst [smem:[#allocation26_spill]] %s2829_s16 }
   0x9   :  { %2855 = sst [smem:[#allocation27_spill]] %s2830_s17 }
   0xa   :  { %22 = vsyncpa [#allocation4], 0 }
   0xb   :  { %24 = vsyncpa [#allocation4 + $0x1], 0  ;;  %s2436_s24 = smov 0   ;;  %s2438_s25 = smov 0  }
   0xc   :  { %s2440_s26 = smov 0   ;;  %s2442_s27 = smov 0  }
   0xd   :  { %s2444_s28 = smov 0   ;;  %s2446_s29 = smov 0  }
   0xe   :  { %s2448_s0 = smov 0   ;;  %s2450_s30 = smov 0  }
   0xf LB: > { %2856 = sst [smem:[#allocation6_spill]] %s2303_s24  ;;  %s1913_s18 = sadd.s32 4294967295, %s2331_s30   ;;  %s2331_s30 = sphi %s2450_s30, %s30_s30   ;;  %s2327_s0 = sphi %s2448_s0, %s2902_s0   ;;  %s2323_s29 = sphi %s2446_s29, %s2901_s29   ;;  %s2319_s28 = sphi %s2444_s28, %s2900_s28   ;;  %s2315_s27 = sphi %s2442_s27, %s2899_s27   ;;  %s2311_s26 = sphi %s2440_s26, %s2898_s26   ;;  %s2307_s25 = sphi %s2438_s25, %s2897_s25   ;;  %s2303_s24 = sphi %s2436_s24, %s2896_s24  }
  0x10   : > { %2857 = sst [smem:[#allocation7_spill]] %s2307_s25  ;;  %s1914_s19 = sadd.s32 4294967294, %s2331_s30  }
  0x11   : > { %2858 = sst [smem:[#allocation8_spill]] %s2311_s26  ;;  %s39_s1 = sadd.s32 1, %s2323_s29 }
  0x12   : > { %2859 = sst [smem:[#allocation9_spill]] %s2315_s27  ;;  %p40_p0 = scmp.ge.s32.totalorder %s39_s1, 2 }
  0x13   : > { %2860 = sst [smem:[#allocation10_spill]] %s2319_s28  ;;  %s42_s20 = sadd.s32 1, %s2327_s0 }
  0x14   : > { %2861 = sst [smem:[#allocation11_spill]] %s2323_s29  ;;  %p481_p1 = scmp.ne.s32.totalorder %s2311_s26, %s2307_s25 }
  0x15   : > { %2862 = sst [smem:[#allocation12_spill]] %s2327_s0  ;;  %p482_p2 = scmp.eq.s32.totalorder %s1913_s18, 3 }
  0x16   : > { %2863 = sst [smem:[#allocation13_spill]] %s2331_s30  ;;  %s2904_s1 = smov (%p40_p0, %s39_s1), 0 }
  0x17   : > { %2864 = sst [smem:[#allocation14_spill]] %s2904_s1  ;;  %s2906_s20 = smov (!%p40_p0, %s42_s20), %s2327_s0 }
  0x18   : > { %p2485_p3 = por %p482_p2, %p481_p1  ;;  %p487_p4 = scmp.ne.s32.totalorder %s2307_s25, %s2303_s24 }
  0x19   : > { %p44_p5 = scmp.ge.s32.totalorder %s2906_s20, 2  ;;  %p488_p6 = scmp.eq.s32.totalorder %s1914_s19, 3 }
  0x1a   : > { %s2865_s21 = scalar_select %p2485_p3, 1, 0 }
  0x1b   : > { %p1917_p7 = scmp.ge.s32.totalorder %s2331_s30, 1  ;;  %p605_p8 = scmp.lt.s32.totalorder %s2331_s30, 5 }
  0x1c   : > { %2866 = sst [smem:[#allocation15_spill]] %s2865_s21  ;;  %s2908_s20 = smov (%p44_p5, %s2906_s20), 0 }
  0x1d   : > { %2867 = sst [smem:[#allocation16_spill]] %s2908_s20  ;;  %p2495_p9 = por %p488_p6, %p487_p4 }
  0x1e   : > { %p606_p10 = pnand %p1917_p7, %p605_p8  ;;  %s468_s23 = ssub.s32 %s2327_s0, %s2908_s20 }
  0x1f   : > { %s2868_s22 = scalar_select %p2495_p9, 1, 0 }
  0x20   : > { %s471_s18 = sadd.s32 1, %s2311_s26  ;;  %p469_p11 = scmp.eq.s32.totalorder %s468_s23, 0 }
  0x21   : > { %2869 = sst [smem:[#allocation17_spill]] %s2868_s22  ;;  %609 = sbr.rel (%p606_p10) target bundleno = 3230 (0xc9e), region = 88 }
  0x22   : > { %s2503_s1 = scalar_select %p469_p11, %s2311_s26, %s471_s18  }
  0x23   : > { %s2836_s19 = sand.u32 (!%p606_p10), 1, %s2307_s25   ;;  %p700_p12 = scmp.lt.s32.totalorder (!%p606_p10), %s2319_s28, 1 }
  0x24   : > { %2870 = sst [smem:[#allocation18_spill]] %s2503_s1  ;;  %s2509_s29 = sshll.u32 (!%p606_p10), %s2836_s19, 3 }
  0x25   : > { %p704_p13 = scmp.lt.s32.totalorder (!%p606_p10), %s2315_s27, 1  ;;  %s2871_s0 = sld [smem:[#allocation19_spill]] (!%p606_p10) }
  0x26   : > { %s2873_s3 = sld [smem:[#allocation21_spill]] (!%p606_p10)  ;;  %s2874_s5 = sld [smem:[#allocation22_spill]] (!%p606_p10) }
  0x27   : > { %s699_s13 = scalar_lea.vmem (!%p606_p10), [#allocation3], %s2509_s29  ;;  %s2875_s14 = sld [smem:[#allocation9_spill]] (!%p606_p10) }
  0x28   : > { %s701_s22 = scalar_select %p700_p12, %s2319_s28, 1 }
  0x29   : > { %s2514_s24 = scalar_select %p704_p13, %s2315_s27, 1 }
  0x2a   : > { %s1919_s23 = sshll.u32 %s701_s22, 3 }
  0x2b   : > { %s703_s19 = scalar_lea.vmem %s2871_s0, %s1919_s23  ;;  %s1973_s16 = sshll.u32 %s2514_s24, 4 }
  0x2c   : > { %s2531_s15 = scalar_lea.vmem %s2873_s3, %s1973_s16  ;;  %s2540_s23 = scalar_lea.vmem %s2874_s5, %s1973_s16 }
  0x2d   : > { %s731_s17 = scalar_lea.vmem %s2821_s8, %s2514_s24  ;;  %s2557_s22 = scalar_lea.vmem %s2822_s9, %s1973_s16 }
  0x2e   : > { %s739_s20 = scalar_lea.vmem %s2823_s10, %s2514_s24  ;;  %s1976_s5 = sshll.u32 %s2514_s24, 6 }
  0x2f   : > { %s747_s25 = scalar_lea.vmem %s2825_s12, %s2514_s24  ;;  %s2571_s28 = scalar_lea.vmem %s2824_s11, %s1976_s5 }
  0x30   : > { %p1928_p0 = scmp.ne.s32.totalorder %s2875_s14, 0 }
  0x31   : > { %v753_v0 = vld [vmem:[%s703_s19] sm:$0xff] (!%p1928_p0)  ;;  %vm754_vm0 = vcmask (!%p1928_p0), 261120  }
  0x32   : > { %752 = sbr.rel (%p1928_p0) target bundleno = 57 (0x39), region = 92  ;;  %755 = vst.msk [vmem:[#allocation2] sm:$0xff] (!%p1928_p0), %vm754_vm0, %v753_v0 }
  0x39 PF: > { %v2575_v1 = vld [vmem:[#allocation2] sm:$0xff]  ;;  %vm759_vm1 = vcmask 261120   ;;  %v2333_v9 = vmov 0.0   ;;  %vm2334_vm2 = vmmov 0   ;;  %v2198_v10 = vld [vmem:[%s2531_s15 + $0x8] sm:$0xff]   ;;  %s2876_s16 = sld [smem:[#allocation20_spill]]  ;;  %s2878_s18 = scalar_lea.vmem %s2815_s2, %s2514_s24 }
  0x3a   : > { %v760_v2 = vsel %vm759_vm1, %v2575_v1, 0.0  ;;  %v2197_v8 = vld [vmem:[%s2531_s15] sm:$0xff]   ;;  %2014 = vmatprep.subr.bf16.mxu0 %v2333_v9  ;;  %2018 = vmatprep.mubr.msk.bf16.mxu0 %vm2334_vm2, %v2333_v9  ;;  %s2879_s30 = scalar_lea.vmem %s2817_s4, %s2514_s24  ;;  %s2335_s1 = smov 104   ;;  %vm872_vm3 = vcmask 64512   ;;  %vm1119_vm4 = vcmask 1043456   ;;  %vm1320_vm5 = vcmask 130048  }
  0x3b   : > { %761 = vadd.xlane.f32.xlu0 %v760_v2  ;;  %2015 = vmatpush3.bf16.msra.mxu0 %v2197_v8  ;;  %v1930_v17 = vld [vmem:[%s2878_s18] ss:$0 sm:$0xff]  ;;  %s2336_s21 = smov 120   ;;  %s2337_s14 = smov 112   ;;  %vm1322_vm6 = vcmask 195584  }
  0x3c   : > { %2034 = vmatprep.subr.bf16.mxu1 %v2333_v9  ;;  %2016 = vmatprep.subr.bf16.mxu0 %v2333_v9  ;;  %v1931_v21 = vld [vmem:[%s2879_s30] ss:$0 sm:$0xff]  ;;  %s2338_s3 = smov 96   ;;  %s2339_s5 = smov 64  }
  0x3d   : > { %2036 = vmatprep.mubr.msk.bf16.mxu1 %vm2334_vm2, %v2333_v9  ;;  %s2342_s19 = smov 24   ;;  %s2880_s18 = scalar_lea.vmem %s2819_s6, %s2514_s24 }
  0x3e   : > { %s2881_s26 = scalar_lea.vmem %s2820_s7, %s2514_s24 }
  0x3f   : > { %2017 = vmatpush3.bf16.msra.mxu0 %v2198_v10  ;;  %s2877_s15 = scalar_lea.vmem %s2876_s16, %s2514_s24  ;;  %s2340_s16 = smov 8  }
  0x40   : > { %2022 = vmatprep.subr.bf16.mxu0 %v2333_v9  ;;  %v1929_v15 = vld [vmem:[%s2877_s15] ss:$0 sm:$0xff]  ;;  %s2341_s15 = smov 16  }
  0xc8   : > { %v762_v3 = vpop.xlane.xlu0 %761 }
  0xc9   : > { %v764_v4 = vmul.f32 0.03125, %v762_v3 }
  0xcb   : > { %v765_v5 = vsub.f32 %v2575_v1, %v764_v4 }
  0xcd   : > { %v766_v6 = vmul.f32 %v765_v5, %v765_v5 }
  0xcf   : > { %v767_v7 = vsel %vm759_vm1, %v766_v6, 0.0 }
  0xd0   : > { %768 = vadd.xlane.f32.xlu0 %v767_v7 }
 0x15d   : > { %v769_v11 = vpop.xlane.xlu0 %768 }
 0x15e   : > { %v770_v12 = vmul.f32 0.03125, %v769_v11 }
 0x160   : > { %v771_v13 = vadd.f32 1e-05, %v770_v12 }
 0x162   : > { %2211 = vrsqrt.f32 %v771_v13 }
 0x16c   : > { %v2212_v14 = vpop.eup %2211 }
 0x16d   : > { %v773_v16 = vmul.f32 %v2212_v14, %v765_v5 }
 0x16f   : > { %v780_v18 = vmul.f32 %v1929_v15, %v773_v16 }
 0x171   : > { %v787_v19 = vadd.f32 %v1930_v17, %v780_v18 }
 0x173   : > { %v788_v20 = vpack.c.bf16 %v787_v19, %v787_v19 }
 0x175   : > { %2019 = vmatmul.mubr.msk.bf16.vlgmr.msra.gmra.mrb[0].mxu0 %vm759_vm1, %v788_v20 }
 0x176   : > { %2024 = vmatprep.mubr.msk.bf16.mxu0 %vm2334_vm2, %v2333_v9 }
 0x248   : > { %v849_v22 = vpop.f32.mrb[0].mxu0 }
 0x249   : > { %v850_v23 = vadd.f32 %v1931_v21, %v849_v22  ;;  %v2020_v24 = vpop.f32.mrb[1].mxu0 }
 0x24a   : > { %v852_v25 = vpop.f32.mrb[2].mxu0 }
 0x24b   : > { %862 = vrot.lane.b32.xlu0 %v850_v23, %s2335_s1  ;;  %856 = vrot.lane.b32.xlu1 %v850_v23, %s2336_s21  ;;  %v2021_v26 = vpop.f32.mrb[3].mxu0  ;;  %v865_v27 = vpack.c.bf16 %v850_v23, %v850_v23 }
 0x24f   : > { %859 = vrot.lane.b32.xlu1 %v850_v23, %s2337_s14 }
 0x253   : > { %870 = vrot.lane.b32.xlu1 %v865_v27, %s2338_s3 }
 0x2bd   : > { %v857_v28 = vpop.permute.xlu1 %856  ;;  %v863_v32 = vpop.permute.xlu0 %862 }
 0x2be   : > { %v2609_v29 = vpack.c.bf16 %v857_v28, %v857_v28  ;;  %v2615_v34 = vpack.c.bf16 %v863_v32, %v863_v32 }
 0x2c0   : > { %920 = vrot.lane.b32.xlu1 %v2609_v29, %s2338_s3 }
 0x2c1   : > { %v860_v30 = vpop.permute.xlu1 %859 }
 0x2c2   : > { %v2612_v31 = vpack.c.bf16 %v860_v30, %v860_v30 }
 0x2c4   : > { %969 = vrot.lane.b32.xlu1 %v2612_v31, %s2338_s3 }
 0x2c5   : > { %v871_v33 = vpop.permute.xlu1 %870 }
 0x2c6   : > { %v877_v35 = vsel %vm872_vm3, %v871_v33, 0 }
 0x2c7   : > { %2023 = vmatpush3.bf16.xpose.msra.mxu0 %v877_v35 }
 0x2c8   : > { %1018 = vrot.lane.b32.xlu1 %v2615_v34, %s2338_s3  ;;  %2028 = vmatprep.subr.bf16.mxu0 %v2333_v9 }
 0x2ce   : > { %2025 = vmatmul.mubr.msk.bf16.vlgmr.msra.gmra.mrb[4].mxu0 %vm872_vm3, %v865_v27 }
 0x2cf   : > { %2030 = vmatprep.mubr.msk.bf16.mxu0 %vm2334_vm2, %v2333_v9 }
 0x332   : > { %v921_v36 = vpop.permute.xlu1 %920 }
 0x333   : > { %v926_v37 = vsel %vm872_vm3, %v921_v36, 0 }
 0x334   : > { %2029 = vmatpush3.bf16.xpose.msra.mxu0 %v926_v37 }
 0x335   : > { %2040 = vmatprep.subr.bf16.mxu0 %v2333_v9 }
 0x336   : > { %v970_v38 = vpop.permute.xlu1 %969 }
 0x337   : > { %v975_v39 = vsel %vm872_vm3, %v970_v38, 0 }
 0x338   : > { %2035 = vmatpush3.bf16.xpose.msra.mxu1 %v975_v39 }
 0x339   : > { %2046 = vmatprep.subr.bf16.mxu1 %v2333_v9 }
 0x33a   : > { %v1019_v40 = vpop.permute.xlu1 %1018 }
 0x33b   : > { %v1024_v41 = vsel %vm872_vm3, %v1019_v40, 0  ;;  %2031 = vmatmul.mubr.msk.bf16.vlgmr.msra.gmra.mrb[8].mxu0 %vm872_vm3, %v2609_v29 }
 0x33c   : > { %2041 = vmatpush3.bf16.xpose.msra.mxu0 %v1024_v41  ;;  %2042 = vmatprep.mubr.msk.bf16.mxu0 %vm2334_vm2, %v2333_v9 }
 0x33d   : > { %2052 = vmatprep.subr.bf16.mxu0 %v2333_v9 }
 0x33f   : > { %2037 = vmatmul.mubr.msk.bf16.vlgmr.msra.gmra.mrb[0].mxu1 %vm872_vm3, %v2612_v31 }
 0x340   : > { %2048 = vmatprep.mubr.msk.bf16.mxu1 %vm2334_vm2, %v2333_v9 }
 0x343   : > { %2043 = vmatmul.mubr.msk.bf16.vlgmr.msra.gmra.mrb[12].mxu0 %vm872_vm3, %v2615_v34 }
 0x344   : > { %2054 = vmatprep.mubr.msk.bf16.mxu0 %vm2334_vm2, %v2333_v9 }
 0x3a1   : > { %v913_v42 = vpop.f32.mrb[4].mxu0 }
 0x3a2   : > { %v2026_v43 = vpop.f32.mrb[5].mxu0  ;;  %v1066_v44 = vsel %vm872_vm3, %v913_v42, -inf }
 0x3a3   : > { %1067 = vmax.xlane.f32.xlu1 %v1066_v44  ;;  %v916_v45 = vpop.f32.mrb[6].mxu0 }
 0x3a4   : > { %v2027_v46 = vpop.f32.mrb[7].mxu0 }
 0x40e   : > { %v962_v47 = vpop.f32.mrb[8].mxu0 }
 0x40f   : > { %v2032_v48 = vpop.f32.mrb[9].mxu0  ;;  %v1069_v49 = vsel %vm872_vm3, %v962_v47, -inf }
 0x410   : > { %1070 = vmax.xlane.f32.xlu0 %v1069_v49  ;;  %v965_v50 = vpop.f32.mrb[10].mxu0  ;;  %v2199_v48 = vld [vmem:[%s2540_s23] sm:$0xff]   ;;  %v2200_v49 = vld [vmem:[%s2540_s23 + $0x8] sm:$0xff]  }
 0x411   : > { %v2033_v51 = vpop.f32.mrb[11].mxu0 }
 0x412   : > { %v1011_v52 = vpop.f32.mrb[0].mxu1 }
 0x413   : > { %v2038_v53 = vpop.f32.mrb[1].mxu1  ;;  %v1072_v54 = vsel %vm872_vm3, %v1011_v52, -inf }
 0x414   : > { %v1014_v55 = vpop.f32.mrb[2].mxu1  ;;  %1073 = vmax.xlane.f32.xlu1 %v1072_v54 }
 0x415   : > { %v2039_v56 = vpop.f32.mrb[3].mxu1 }
 0x416   : > { %v1060_v57 = vpop.f32.mrb[12].mxu0 }
 0x417   : > { %v2044_v58 = vpop.f32.mrb[13].mxu0  ;;  %v1075_v59 = vsel %vm872_vm3, %v1060_v57, -inf }
 0x418   : > { %1076 = vmax.xlane.f32.xlu0 %v1075_v59  ;;  %v1063_v60 = vpop.f32.mrb[14].mxu0 }
 0x419   : > { %v2045_v61 = vpop.f32.mrb[15].mxu0 }
 0x425   : > { %1114 = vrot.lane.b32.xlu1 %v865_v27, %s2339_s5 }
 0x430   : > { %v1068_v62 = vpop.xlane.xlu1 %1067 }
 0x431   : > { %v1078_v63 = vsub.f32 %v913_v42, %v1068_v62 }
 0x433   : > { %v1082_v0 = vmul.f32 1.442695, %v1078_v63 }
 0x435   : > { %2213 = vpow2.f32 %v1082_v0 }
 0x43f   : > { %v2214_v2 = vpop.eup %2213 }
 0x440   : > { %v1090_v3 = vsel %vm872_vm3, %v2214_v2, 0.0 }
 0x449   : > { %1091 = vadd.xlane.f32.xlu1 %v1090_v3 }
 0x49d   : > { %v1071_v4 = vpop.xlane.xlu0 %1070 }
 0x49e   : > { %v1079_v5 = vsub.f32 %v962_v47, %v1071_v4 }
 0x4a0   : > { %v1084_v6 = vmul.f32 1.442695, %v1079_v5 }
 0x4a1   : > { %v1074_v7 = vpop.xlane.xlu1 %1073 }
 0x4a2   : > { %2215 = vpow2.f32 %v1084_v6  ;;  %v1080_v8 = vsub.f32 %v1011_v52, %v1074_v7  ;;  %v1946_v7 = vld [vmem:[%s2880_s18] ss:$0 sm:$0xff] }
 0x4a4   : > { %v1086_v10 = vmul.f32 1.442695, %v1080_v8 }
 0x4a5   : > { %v1115_v11 = vpop.permute.xlu1 %1114  ;;  %v1077_v12 = vpop.xlane.xlu0 %1076 }
 0x4a6   : > { %2217 = vpow2.f32 %v1086_v10  ;;  %v1121_v13 = vsel %vm1119_vm4, %v1115_v11, 0  ;;  %v1081_v14 = vsub.f32 %v1060_v57, %v1077_v12 }
 0x4a7   : > { %2047 = vmatpush3.bf16.msra.mxu1 %v1121_v13 }
 0x4a8   : > { %v1088_v15 = vmul.f32 1.442695, %v1081_v14  ;;  %2058 = vmatprep.subr.bf16.mxu1 %v2333_v9 }
 0x4aa   : > { %2219 = vpow2.f32 %v1088_v15 }
 0x4ac   : > { %v2216_v16 = vpop.eup %2215 }
 0x4ad   : > { %v1093_v17 = vsel %vm872_vm3, %v2216_v16, 0.0 }
 0x4ae   : > { %1094 = vadd.xlane.f32.xlu0 %v1093_v17 }
 0x4b0   : > { %v2218_v18 = vpop.eup %2217 }
 0x4b1   : > { %v1096_v19 = vsel %vm872_vm3, %v2218_v18, 0.0 }
 0x4b2   : > { %1097 = vadd.xlane.f32.xlu1 %v1096_v19  ;;  %v2201_v19 = vld [vmem:[%s2557_s22] sm:$0xff]  }
 0x4b4   : > { %v2220_v20 = vpop.eup %2219 }
 0x4b5   : > { %v1099_v21 = vsel %vm872_vm3, %v2220_v20, 0.0 }
 0x4b6   : > { %1100 = vadd.xlane.f32.xlu0 %v1099_v21  ;;  %v2203_v21 = vld [vmem:[%s2571_s28] sm:$0xff]  }
 0x4c3   : > { %1211 = vrot.lane.b32.xlu1 %v2612_v31, %s2339_s5 }
 0x4c7   : > { %1259 = vrot.lane.b32.xlu1 %v2615_v34, %s2339_s5 }
 0x4cc   : > { %1163 = vrot.lane.b32.xlu0 %v2609_v29, %s2339_s5 }
 0x4d6   : > { %v1092_v22 = vpop.xlane.xlu1 %1091 }
 0x4d7   : > { %2221 = vrcp.f32 %v1092_v22  ;;  %v2204_v22 = vld [vmem:[%s2571_s28 + $0x8] sm:$0xff]  }
 0x4e1   : > { %v2222_v23 = vpop.eup %2221 }
 0x4e2   : > { %v1106_v24 = vmul.f32 %v2222_v23, %v2214_v2  ;;  %v2205_v23 = vld [vmem:[%s2571_s28 + $0x10] sm:$0xff]  }
 0x4e4   : > { %v1110_v25 = vpack.c.bf16 %v1106_v24, %v1106_v24 }
 0x4e6   : > { %2049 = vmatmul.mubr.msk.bf16.vlgmr.msra.gmra.mrb[4].mxu1 %vm872_vm3, %v1110_v25 }
 0x4e7   : > { %2060 = vmatprep.mubr.msk.bf16.mxu1 %vm2334_vm2, %v2333_v9 }
 0x53b   : > { %v1095_v26 = vpop.xlane.xlu0 %1094 }
 0x53c   : > { %2223 = vrcp.f32 %v1095_v26 }
 0x53f   : > { %v1098_v27 = vpop.xlane.xlu1 %1097 }
 0x540   : > { %2225 = vrcp.f32 %v1098_v27 }
 0x543   : > { %v1212_v28 = vpop.permute.xlu1 %1211  ;;  %v1101_v30 = vpop.xlane.xlu0 %1100 }
 0x544   : > { %v1217_v31 = vsel %vm1119_vm4, %v1212_v28, 0  ;;  %2227 = vrcp.f32 %v1101_v30  ;;  %v1947_v28 = vld [vmem:[%s2881_s26] ss:$0 sm:$0xff] }
 0x545   : > { %2059 = vmatpush3.bf16.msra.mxu1 %v1217_v31  ;;  %v1948_v31 = vld [vmem:[%s731_s17] ss:$0 sm:$0xff] }
 0x546   : > { %v2224_v29 = vpop.eup %2223  ;;  %2070 = vmatprep.subr.bf16.mxu1 %v2333_v9 }
 0x547   : > { %v1107_v32 = vmul.f32 %v2224_v29, %v2216_v16  ;;  %v1164_v33 = vpop.permute.xlu0 %1163  ;;  %v1260_v35 = vpop.permute.xlu1 %1259 }
 0x548   : > { %v1169_v34 = vsel %vm1119_vm4, %v1164_v33, 0  ;;  %v1265_v39 = vsel %vm1119_vm4, %v1260_v35, 0  ;;  %v2207_v35 = vld [vmem:[%s2571_s28 + $0x20] sm:$0xff]  }
 0x549   : > { %2053 = vmatpush3.bf16.msra.mxu0 %v1169_v34  ;;  %v1111_v36 = vpack.c.bf16 %v1107_v32, %v1107_v32  ;;  %v2206_v34 = vld [vmem:[%s2571_s28 + $0x18] sm:$0xff]  }
 0x54a   : > { %v2226_v37 = vpop.eup %2225  ;;  %2064 = vmatprep.subr.bf16.mxu0 %v2333_v9 }
 0x54b   : > { %v1108_v38 = vmul.f32 %v2226_v37, %v2218_v18  ;;  %v2209_v37 = vld [vmem:[%s2571_s28 + $0x30] sm:$0xff]  }
 0x54c   : > { %2055 = vmatmul.mubr.msk.bf16.vlgmr.msra.gmra.mrb[16].mxu0 %vm872_vm3, %v1111_v36  ;;  %v2208_v36 = vld [vmem:[%s2571_s28 + $0x28] sm:$0xff]  }
 0x54d   : > { %2065 = vmatpush3.bf16.msra.mxu0 %v1265_v39  ;;  %v1112_v40 = vpack.c.bf16 %v1108_v38, %v1108_v38  ;;  %2066 = vmatprep.mubr.msk.bf16.mxu0 %vm2334_vm2, %v2333_v9  ;;  %v2210_v38 = vld [vmem:[%s2571_s28 + $0x38] sm:$0xff]   ;;  %v1949_v39 = vld [vmem:[%s739_s20] ss:$0 sm:$0xff]  ;;  %s2882_s20 = sld [smem:[#allocation9_spill]] }
 0x54e   : > { %v2228_v41 = vpop.eup %2227  ;;  %2078 = vmatprep.subr.bf16.mxu0 %v2333_v9 }
 0x54f   : > { %v1109_v42 = vmul.f32 %v2228_v41, %v2220_v20  ;;  %2061 = vmatmul.mubr.msk.bf16.vlgmr.msra.gmra.mrb[8].mxu1 %vm872_vm3, %v1112_v40  ;;  %v2202_v20 = vld [vmem:[%s2557_s22 + $0x8] sm:$0xff]  }
 0x550   : > { %2074 = vmatprep.mubr.msk.bf16.mxu1 %vm2334_vm2, %v2333_v9  ;;  %2071 = vmatpush3.bf16.msra.mxu1 %v2199_v48 }
 0x551   : > { %v1113_v43 = vpack.c.bf16 %v1109_v42, %v1109_v42  ;;  %2072 = vmatprep.subr.bf16.mxu1 %v2333_v9 }
 0x553   : > { %p1962_p1 = scmp.ne.s32.totalorder %s2882_s20, 1 }
 0x554   : > { %2067 = vmatmul.mubr.msk.bf16.vlgmr.msra.gmra.mrb[20].mxu0 %vm872_vm3, %v1113_v43  ;;  %2073 = vmatpush3.bf16.msra.mxu1 %v2200_v49  ;;  %s2883_s3 = sld [smem:[#allocation25_spill]] (!%p1962_p1)  ;;  %vm2344_vm7 = vmmov (!%p1962_p1), 0   ;;  %s2884_s23 = sld [smem:[#allocation23_spill]] (!%p1962_p1) }
 0x555   : > { %2082 = vmatprep.mubr.msk.bf16.mxu0 %vm2334_vm2, %v2333_v9  ;;  %2086 = vmatprep.subr.bf16.mxu1 %v2333_v9  ;;  %s2885_s22 = sld [smem:[#allocation24_spill]] (!%p1962_p1)  ;;  %s2886_s30 = sld [smem:[#allocation26_spill]] (!%p1962_p1) }
 0x556   : > { %2079 = vmatpush3.bf16.msra.mxu0 %v2201_v19 }
 0x557   : > { %2080 = vmatprep.subr.bf16.mxu0 %v2333_v9 }
 0x55a   : > { %2081 = vmatpush3.bf16.msra.mxu0 %v2202_v20 }
 0x5b9   : > { %v1157_v44 = vpop.f32.mrb[4].mxu1 }
 0x5ba   : > { %v2050_v45 = vpop.f32.mrb[5].mxu1 }
 0x5bb   : > { %v1160_v46 = vpop.f32.mrb[6].mxu1 }
 0x5bc   : > { %v2051_v47 = vpop.f32.mrb[7].mxu1 }
 0x61f   : > { %v1205_v50 = vpop.f32.mrb[16].mxu0 }
 0x620   : > { %1308 = vrot.lane.b32.xlu0 %v1205_v50, %s2340_s16  ;;  %v2056_v51 = vpop.f32.mrb[17].mxu0  ;;  %v1953_v50 = vld [vmem:[%s747_s25] ss:$0 sm:$0xff] }
 0x621   : > { %v1208_v52 = vpop.f32.mrb[18].mxu0 }
 0x622   : > { %v2057_v53 = vpop.f32.mrb[19].mxu0  ;;  %v1253_v54 = vpop.f32.mrb[8].mxu1 }
 0x623   : > { %1312 = vrot.lane.b32.xlu1 %v1253_v54, %s2341_s15  ;;  %v2062_v55 = vpop.f32.mrb[9].mxu1 }
 0x624   : > { %v1256_v56 = vpop.f32.mrb[10].mxu1 }
 0x625   : > { %v2063_v57 = vpop.f32.mrb[11].mxu1 }
 0x627   : > { %v1301_v58 = vpop.f32.mrb[20].mxu0 }
 0x628   : > { %1316 = vrot.lane.b32.xlu0 %v1301_v58, %s2342_s19  ;;  %v2068_v59 = vpop.f32.mrb[21].mxu0 }
 0x629   : > { %v1304_v60 = vpop.f32.mrb[22].mxu0 }
 0x62a   : > { %v2069_v61 = vpop.f32.mrb[23].mxu0 }
 0x692   : > { %v1309_v62 = vpop.permute.xlu0 %1308 }
 0x693   : > { %v1319_v0 = vsel %vm872_vm3, %v1157_v44, %v1309_v62 }
 0x695   : > { %v1313_v63 = vpop.permute.xlu1 %1312 }
 0x696   : > { %v1321_v2 = vsel %vm1320_vm5, %v1319_v0, %v1313_v63  ;;  %v2233_v63 = vld [vmem:[%s2883_s3] sm:$0xff] (!%p1962_p1)   ;;  %v2343_v0 = vmov (!%p1962_p1), 0.0  }
 0x697   : > { %2106 = vmatprep.subr.bf16.mxu0 (!%p1962_p1), %v2343_v0 }
 0x69a   : > { %v1317_v3 = vpop.permute.xlu0 %1316 }
 0x69b   : > { %v1323_v4 = vsel %vm1322_vm6, %v1321_v2, %v1317_v3  ;;  %v2234_v2 = vld [vmem:[%s2883_s3 + $0x8] sm:$0xff] (!%p1962_p1)  }
 0x69c   : > { %v1324_v5 = vpack.c.bf16 %v1323_v4, %v1323_v4 }
 0x69e   : > { %2075 = vmatmul.mubr.msk.bf16.vlgmr.msra.gmra.mrb[12].mxu1 %vm759_vm1, %v1324_v5 }
 0x69f   : > { %2102 = vmatprep.mubr.msk.bf16.mxu1 %vm2334_vm2, %v2333_v9  ;;  %2087 = vmatpush3.bf16.msra.mxu1 %v2203_v21 }
 0x6a0   : > { %2088 = vmatprep.subr.bf16.mxu1 %v2333_v9 }
 0x6a3   : > { %2089 = vmatpush3.bf16.msra.mxu1 %v2204_v22 }
 0x6a4   : > { %2090 = vmatprep.subr.bf16.mxu1 %v2333_v9 }
 0x6a7   : > { %2091 = vmatpush3.bf16.msra.mxu1 %v2205_v23 }
 0x6a8   : > { %2092 = vmatprep.subr.bf16.mxu1 %v2333_v9 }
 0x6ab   : > { %2093 = vmatpush3.bf16.msra.mxu1 %v2206_v34 }
 0x6ac   : > { %2094 = vmatprep.subr.bf16.mxu1 %v2333_v9 }
 0x6af   : > { %2095 = vmatpush3.bf16.msra.mxu1 %v2207_v35 }
 0x6b0   : > { %2096 = vmatprep.subr.bf16.mxu1 %v2333_v9 }
 0x6b3   : > { %2097 = vmatpush3.bf16.msra.mxu1 %v2208_v36 }
 0x6b4   : > { %2098 = vmatprep.subr.bf16.mxu1 %v2333_v9 }
 0x6b7   : > { %2099 = vmatpush3.bf16.msra.mxu1 %v2209_v37 }
 0x6b8   : > { %2100 = vmatprep.subr.bf16.mxu1 %v2333_v9 }
 0x6bb   : > { %2101 = vmatpush3.bf16.msra.mxu1 %v2210_v38 }
 0x771   : > { %v1378_v6 = vpop.f32.mrb[12].mxu1 }
 0x772   : > { %v1384_v8 = vadd.f32 %v1378_v6, %v2575_v1  ;;  %v2076_v10 = vpop.f32.mrb[13].mxu1 }
 0x773   : > { %v1381_v11 = vpop.f32.mrb[14].mxu1  ;;  %v1964_v10 = vld [vmem:[%s2885_s22] ss:$0 sm:$0xff] (!%p1962_p1) }
 0x774   : > { %v2690_v12 = vadd.f32 %v1946_v7, %v1384_v8  ;;  %v2077_v13 = vpop.f32.mrb[15].mxu1  ;;  %v1963_v7 = vld [vmem:[%s2884_s23] ss:$0 sm:$0xff] (!%p1962_p1) }
 0x776   : > { %v1395_v14 = vsel %vm759_vm1, %v2690_v12, 0.0 }
 0x777   : > { %1396 = vadd.xlane.f32.xlu1 %v1395_v14  ;;  %v1965_v14 = vld [vmem:[%s2886_s30] ss:$0 sm:$0xff] (!%p1962_p1) }
 0x804   : > { %v1397_v15 = vpop.xlane.xlu1 %1396 }
 0x805   : > { %v1398_v16 = vmul.f32 0.03125, %v1397_v15 }
 0x807   : > { %v1399_v17 = vsub.f32 %v2690_v12, %v1398_v16 }
 0x809   : > { %v1400_v18 = vmul.f32 %v1399_v17, %v1399_v17 }
 0x80b   : > { %v1401_v1 = vsel %vm759_vm1, %v1400_v18, 0.0 }
 0x80c   : > { %1402 = vadd.xlane.f32.xlu0 %v1401_v1 }
 0x899   : > { %v1403_v24 = vpop.xlane.xlu0 %1402 }
 0x89a   : > { %v1404_v25 = vmul.f32 0.03125, %v1403_v24 }
 0x89c   : > { %v1405_v26 = vadd.f32 1e-05, %v1404_v25 }
 0x89e   : > { %2229 = vrsqrt.f32 %v1405_v26 }
 0x8a8   : > { %v2230_v27 = vpop.eup %2229 }
 0x8a9   : > { %v1407_v30 = vmul.f32 %v2230_v27, %v1399_v17 }
 0x8ab   : > { %v1414_v29 = vmul.f32 %v1947_v28, %v1407_v30 }
 0x8ad   : > { %v1421_v32 = vadd.f32 %v1948_v31, %v1414_v29 }
 0x8af   : > { %v1422_v33 = vpack.c.bf16 %v1421_v32, %v1421_v32 }
 0x8b1   : > { %2083 = vmatmul.mubr.msk.bf16.vlgmr.msra.gmra.mrb[24].mxu0 %vm759_vm1, %v1422_v33 }
 0x8b2   : > { %2110 = vmatprep.mubr.msk.bf16.mxu0 (!%p1962_p1), %vm2344_vm7, %v2343_v0  ;;  %2107 = vmatpush3.bf16.msra.mxu0 (!%p1962_p1), %v2233_v63 }
 0x8b3   : > { %2108 = vmatprep.subr.bf16.mxu0 (!%p1962_p1), %v2343_v0 }
 0x8b6   : > { %2109 = vmatpush3.bf16.msra.mxu0 (!%p1962_p1), %v2234_v2 }
 0x984   : > { %v1483_v40 = vpop.f32.mrb[24].mxu0 }
 0x985   : > { %v1484_v41 = vadd.f32 %v1949_v39, %v1483_v40  ;;  %v2084_v42 = vpop.f32.mrb[25].mxu0 }
 0x986   : > { %v1486_v43 = vpop.f32.mrb[26].mxu0 }
 0x987   : > { %v1490_v44 = vmul.f32 0.70710677, %v1484_v41  ;;  %v2085_v45 = vpop.f32.mrb[27].mxu0  ;;  %v1489_v47 = vmul.f32 0.5, %v1484_v41 }
 0x989   : > { %2231 = verf.f32 %v1490_v44 }
 0x993   : > { %v2232_v46 = vpop.eup %2231 }
 0x994   : > { %v1492_v48 = vadd.f32 1.0, %v2232_v46 }
 0x996   : > { %v1493_v49 = vmul.f32 %v1492_v48, %v1489_v47 }
 0x998   : > { %v1494_v9 = vpack.c.bf16 %v1493_v49, %v1493_v49 }
 0x99a   : > { %2103 = vmatmul.mubr.bf16.vlgmr.msra.gmra.mrb[16].mxu1 %v1494_v9 }
 0xa6c   : > { %1611 = sbr.rel (%p1962_p1) target bundleno = 3204 (0xc84), region = 96 }
 0xa6d   : > { %v1600_v51 = vpop.f32.mrb[16].mxu1 }
 0xa6e   : > { %v1601_v52 = vadd.f32 %v1953_v50, %v1600_v51  ;;  %v2104_v53 = vpop.f32.mrb[17].mxu1 }
 0xa6f   : > { %v1603_v54 = vpop.f32.mrb[18].mxu1 }
 0xa70   : > { %v1606_v55 = vadd.f32 %v1601_v52, %v2690_v12  ;;  %v2105_v56 = vpop.f32.mrb[19].mxu1 }
 0xa72   : > { %1607 = vst.msk [vmem:[#allocation2] sm:$0xff] %vm759_vm1, %v1606_v55  ;;  %v1614_v57 = vsel (!%p1962_p1), %vm759_vm1, %v1606_v55, 0.0 }
 0xa73   : > { %1615 = vadd.xlane.f32.xlu0 %v1614_v57 }
 0xb00   : > { %v1616_v58 = vpop.xlane.xlu0 %1615 }
 0xb01   : > { %v1617_v59 = vmul.f32 0.03125, %v1616_v58 }
 0xb03   : > { %v1618_v60 = vsub.f32 %v1606_v55, %v1617_v59 }
 0xb05   : > { %v1619_v61 = vmul.f32 %v1618_v60, %v1618_v60 }
 0xb07   : > { %v1620_v62 = vsel %vm759_vm1, %v1619_v61, 0.0 }
 0xb08   : > { %1621 = vadd.xlane.f32.xlu0 %v1620_v62 }
 0xb95   : > { %v1622_v3 = vpop.xlane.xlu0 %1621 }
 0xb96   : > { %v1623_v4 = vmul.f32 0.03125, %v1622_v3 }
 0xb98   : > { %v1624_v5 = vadd.f32 1e-05, %v1623_v4 }
 0xb9a   : > { %2235 = vrsqrt.f32 %v1624_v5 }
 0xba4   : > { %v2236_v6 = vpop.eup %2235 }
 0xba5   : > { %v1626_v8 = vmul.f32 %v2236_v6, %v1618_v60 }
 0xba7   : > { %v1633_v11 = vmul.f32 %v1963_v7, %v1626_v8 }
 0xba9   : > { %v1640_v12 = vadd.f32 %v1964_v10, %v1633_v11 }
 0xbab   : > { %v1641_v13 = vpack.c.bf16 %v1640_v12, %v1640_v12 }
 0xbad   : > { %2111 = vmatmul.mubr.msk.bf16.vlgmr.msra.gmra.mrb[0].mxu0 %vm759_vm1, %v1641_v13 }
 0xc80   : > { %v1702_v15 = vpop.f32.mrb[0].mxu0 }
 0xc81   : > { %v1703_v16 = vadd.f32 %v1965_v14, %v1702_v15  ;;  %v2112_v17 = vpop.f32.mrb[1].mxu0 }
 0xc82   : > { %v1705_v18 = vpop.f32.mrb[2].mxu0 }
 0xc83   : > { %1708 = vst [vmem:[%s699_s13] sm:$0xff] %v1703_v16  ;;  %v2113_v1 = vpop.f32.mrb[3].mxu0 }
 0xc84 PF: > { %s2887_s1 = sld [smem:[#allocation10_spill]]  ;;  %s2888_s17 = sld [smem:[#allocation7_spill]] }
 0xc85   : > { %s2890_s24 = sld [smem:[#allocation27_spill]]  ;;  %s1723_s16 = sshll.u32 %s699_s13, 4  ;;  %s1724_s16 = int_to_ptr.vmem [resolvable:$true] %s1723_s16 }
 0xc86   : > { %s2237_s23 = scalar_lea.vmem %s1724_s16, 128  ;;  %s2345_s27 = smov [#allocation3]  }
 0xc87   : > { %p2238_p2 = scmp.ne.s32.totalorder %s1724_s16, %s2237_s23  ;;  %s2241_s18 = sshll.u32 %s2345_s27, 4  ;;  %s2242_s18 = int_to_ptr.vmem [resolvable:$false] %s2241_s18 }
 0xc88   : > { %s2243_s22 = scalar_lea.vmem %s2242_s18, 256  ;;  %p2244_p6 = scmp.lt.s32.totalorder %s1724_s16, %s2242_s18 }
 0xc89   : > { %p2239_p4 = pnand %p2238_p2, %p2485_p3  ;;  %p2245_p7 = scmp.lt.s32.totalorder %s2243_s22, %s2237_s23 }
 0xc8a   : > { %s1970_s28 = sshll.u32 %s2887_s1, 7  ;;  %s2892_s15 = sand.u32 1, %s2888_s17  }
 0xc8b   : > { %s2891_s5 = smov %s2890_s24  ;;  %s2762_s25 = scalar_lea.hbm %s2890_s24, %s1970_s28 }
 0xc8c   : > { %s1710_s19 = scalar_lea.sflag [#allocation4], %s2892_s15  ;;  %p2240_p5 = pneg %p2239_p4 }
 0xc8d   : > { %p2246_p8 = por %p2245_p7, %p2244_p6 }
 0xc8f   : > { %p2247_p10 = pnand %p2246_p8, %p2240_p5 }
 0xc91   : > { %2250 = shalt.err (!%p2247_p10)
}
 0xc92   : > { %s2251_s29 = scalar_lea.hbm %s2762_s25, 128  ;;  %s2255_s26 = scalar_lea.hbm %s2891_s5, 256 }
 0xc93   : > { %p2252_p11 = scmp.ne.s32.totalorder %s2762_s25, %s2251_s29  ;;  %p2256_p0 = scmp.lt.u32.totalorder %s2762_s25, %s2891_s5 }
 0xc94   : > { %p2257_p1 = scmp.lt.u32.totalorder %s2255_s26, %s2251_s29  ;;  %p2259_p4 = scmp.lt.u32.totalorder %s2251_s29, %s2762_s25 }
 0xc95   : > { %p2253_p12 = pnand %p2252_p11, %p2485_p3 }
 0xc96   : > { %p2258_p2 = por %p2257_p1, %p2256_p0 }
 0xc97   : > { %p2254_p13 = pneg %p2253_p12 }
 0xc98   : > { %p2260_p5 = por %p2259_p4, %p2258_p2 }
 0xc9a   : > { %p2261_p6 = pnand %p2260_p5, %p2254_p13 }
 0xc9c   : > { %2264 = shalt.err (!%p2261_p6)
}
 0xc9d   : > { %2114 = dma.vmem_to_hbm [thread:$0]  (%p2485_p3), %s1724_s16, 128, %s2762_s25, %s1710_s19  }
 0xc9e PF: > { %s2893_s17 = sld [smem:[#allocation13_spill]]  ;;  %s2894_s28 = sld [smem:[#allocation6_spill]] }
 0xca4   : > { %p2120_p7 = scmp.ge.s32.totalorder %s2893_s17, 2  ;;  %s1735_s20 = sand.u32 1, %s2894_s28  }
 0xca5   : > { %s1736_s24 = scalar_lea.sflag [#allocation4], %s1735_s20 }
 0xca6   : > { %p2117_p8 = pnand %p2120_p7, %p2495_p9 }
 0xca8   : > { %2298 = dma.done.wait (!%p2117_p8), %s1736_s24, 128  }
 0xca9   : > { %2300 = vsyncadd (!%p2117_p8), %s1736_s24, 4294967168  ;;  %s30_s30 = sadd.s32 1, %s2893_s17   ;;  %s2896_s24 = sld [smem:[#allocation7_spill]] }
 0xcaa   : > { %p27_p10 = scmp.ge.s32.totalorder %s30_s30, 6   ;;  %s2897_s25 = sld [smem:[#allocation8_spill]] }
 0xcab   : > { %s2898_s26 = sld [smem:[#allocation18_spill]]  ;;  %s2899_s27 = sld [smem:[#allocation11_spill]] }
 0xcac   : > { %s2900_s28 = sld [smem:[#allocation12_spill]]  ;;  %s2901_s29 = sld [smem:[#allocation14_spill]] }
 0xcad   : > { %s2902_s0 = sld [smem:[#allocation16_spill]]  ;;  %29 = sbr.rel (!%p27_p10) target bundleno = 15 (0xf), region = 167 }
 0xcb4   :  { %1741 = vsyncpa [#allocation4], 1 }
 0xcb5   :  { %1743 = vsyncpa [#allocation4 + $0x1], 1 }

</bundles_post_ra>
